<compile_context>
chip_gen: v7x
topology: tpu7x:2x2x1
jax: 0.10.0
libtpu: 0.0.40
codegen_flags: <defaults>
</compile_context>

<pallas_src>
import functools

import jax
import jax.numpy as jnp
from jax.experimental import pallas as pl
from jax.experimental.pallas import tpu as pltpu


def _patch_gather_kernel(*refs, H, pD, pH, Ho, weighted):
    # refs: x_ref (T, pD*H, W) [, wmap_ref (pD*H, W)], sel_ref (W, Wo),
    #       o_ref (T, Ho*Wo)
    if weighted:
        x_ref, wmap_ref, sel_ref, o_ref = refs
    else:
        x_ref, sel_ref, o_ref = refs

    def slab(pd):
        v = x_ref[:, pd * H:(pd + 1) * H, :].astype(jnp.float32)   # (T, H, W)
        if weighted:
            w = wmap_ref[pd * H:(pd + 1) * H, :].astype(jnp.float32)
            v = v * w[None, :, :]
        return v

    # Depth pool: pD dense, contiguous slices summed on the VPU.
    z = slab(0)
    for pd in range(1, pD):
        z = z + slab(pd)

    sel = sel_ref[...].astype(jnp.float32)

    # H pool (VPU adds over <=pH rows per group, ragged last group handled by
    # the static trip count) + W pool (one lane-dense (T, W) @ (W, Wo) MXU
    # matmul per group).  Concatenate along lanes -> one dense (T, Ho*Wo) store.
    pieces = []
    for ho in range(Ho):
        h0 = ho * pH
        h1 = min(H, h0 + pH)
        g = z[:, h0, :]
        for h in range(h0 + 1, h1):
            g = g + z[:, h, :]
        pieces.append(jnp.dot(g, sel, preferred_element_type=jnp.float32))
    out = pieces[0] if Ho == 1 else jnp.concatenate(pieces, axis=1)
    o_ref[...] = out.astype(o_ref.dtype)


def _pick_rows_per_step(num_slabs, slab_bytes, target_bytes):
    """Slabs per grid step: ~target_bytes input blocks, >= 2 grid steps when
    possible (v7x has 2 TensorCores), and a multiple of 8 (or the full extent)
    so the (T, Ho*Wo) output BlockSpec satisfies the (8, 128) rule."""
    t = max(1, min(num_slabs, target_bytes // max(slab_bytes, 1)))
    if num_slabs >= 2:
        t = min(t, (num_slabs + 1) // 2)
    if t < num_slabs:
        t = (t // 8) * 8
        if t < 8:
            t = num_slabs  # tiny problem: one full-extent block
    return int(t)


@functools.partial(
    jax.jit, static_argnames=("patch_size", "flatten_flag", "block_target_bytes")
)
def patch_gather(x, weight=None, patch_size=(2, 4, 4), flatten_flag=True,
                 block_target_bytes=2 * 1024 * 1024):
    """x: [B, 1, D, H, W] (NCDHW, same layout as the PyTorch Conv3d input).

    weight=None means the module's frozen all-ones Conv3d weight (fast path);
    an explicit (1, 1, pD, pH, pW) weight array is also supported.
    """
    B, C, D, H, W = x.shape
    assert C == 1, "PatchGather uses Conv3d(1, 1, ...); input must have 1 channel"
    pD, pH, pW = patch_size
    Do, Ho, Wo = -(-D // pD), -(-H // pH), -(-W // pW)

    # Only the (cheap, usually absent) depth padding is materialized; ragged
    # H / W are handled inside the kernel, so they cost no extra HBM pass.
    # TODO(synk): fold the depth padding into the kernel as a masked tail slab.
    pad_d = (-D) % pD
    if pad_d:
        x = jnp.pad(x, ((0, 0), (0, 0), (0, pad_d), (0, 0), (0, 0)))

    G = B * Do       # number of (batch, depth-patch) slabs
    R = pD * H       # rows per slab
    # Free reshape (contiguous splits/merges only): [B,1,Dp,H,W] -> [B*Do, pD*H, W]
    xr = x.reshape(G, R, W)

    # 0/1 lane-group pooling matrix (w // pW == wo) -- handles ragged W for free.
    sel = ((jnp.arange(W)[:, None] // pW) == jnp.arange(Wo)[None, :]).astype(
        jnp.float32
    )

    T = _pick_rows_per_step(G, R * W * x.dtype.itemsize, block_target_bytes)
    grid = ((G + T - 1) // T,)

    x_spec = pl.BlockSpec((T, R, W), lambda i: (i, 0, 0))
    sel_spec = pl.BlockSpec((W, Wo), lambda i: (0, 0))
    out_spec = pl.BlockSpec((T, Ho * Wo), lambda i: (i, 0))

    if weight is None:
        weighted = False
        in_specs = [x_spec, sel_spec]
        operands = (xr, sel)
    else:
        weighted = True
        w3 = weight.reshape(pD, pH, pW).astype(jnp.float32)
        rr = jnp.arange(R)
        wmap = w3[(rr // H)[:, None], ((rr % H) % pH)[:, None],
                  (jnp.arange(W) % pW)[None, :]]                    # (R, W)
        in_specs = [x_spec, pl.BlockSpec((R, W), lambda i: (0, 0)), sel_spec]
        operands = (xr, wmap, sel)

    kernel = functools.partial(
        _patch_gather_kernel, H=H, pD=pD, pH=pH, Ho=Ho, weighted=weighted
    )

    out = pl.pallas_call(
        kernel,
        out_shape=jax.ShapeDtypeStruct((G, Ho * Wo), x.dtype),
        grid=grid,
        in_specs=in_specs,
        out_specs=out_spec,
        compiler_params=pltpu.CompilerParams(
            dimension_semantics=("parallel",),
            vmem_limit_bytes=32 * 1024 * 1024,
        ),
    )(*operands)

    if flatten_flag:
        # flatten(2).transpose(1, 2): [B,1,Do,Ho,Wo] -> [B, Do*Ho*Wo, 1]  (free)
        return out.reshape(B, Do * Ho * Wo, 1)
    return out.reshape(B, 1, Do, Ho, Wo)


def _reference(x, weight, patch_size=(2, 4, 4), flatten_flag=True):
    """Pure-JAX reference (matches PyTorch PatchGather)."""
    B, C, D, H, W = x.shape
    pD, pH, pW = patch_size
    xp = jnp.pad(
        x, ((0, 0), (0, 0), (0, (-D) % pD), (0, (-H) % pH), (0, (-W) % pW))
    )
    Dp, Hp, Wp = xp.shape[2:]
    Do, Ho, Wo = Dp // pD, Hp // pH, Wp // pW
    patches = xp.reshape(B, 1, Do, pD, Ho, pH, Wo, pW).astype(jnp.float32)
    w = weight.reshape(1, 1, 1, pD, 1, pH, 1, pW).astype(jnp.float32)
    y = (patches * w).sum(axis=(3, 5, 7))
    if flatten_flag:
        return y.reshape(B, 1, Do * Ho * Wo).transpose(0, 2, 1).astype(x.dtype)
    return y.astype(x.dtype)


if __name__ == "__main__":
    patch_size = (2, 4, 4)
    ones_w = jnp.ones((1, 1) + patch_size, dtype=jnp.float32)

    key = jax.random.PRNGKey(0)
    k1, k2, k3, k4 = jax.random.split(key, 4)

    # 1) Ragged D/H/W: exercises in-kernel H/W raggedness + the depth-pad path.
    x = jax.random.normal(k1, (2, 1, 3, 14, 15), dtype=jnp.float32)
    out = jax.block_until_ready(patch_gather(x, patch_size=patch_size))
    ref = _reference(x, ones_w, patch_size, True)
    assert out.shape == ref.shape, (out.shape, ref.shape)
    assert jnp.allclose(out, ref, atol=1e-5, rtol=1e-5), "mismatch (flatten=True)"

    out5 = jax.block_until_ready(
        patch_gather(x, patch_size=patch_size, flatten_flag=False)
    )
    ref5 = _reference(x, ones_w, patch_size, False)
    assert out5.shape == ref5.shape
    assert jnp.allclose(out5, ref5, atol=1e-5, rtol=1e-5), "mismatch (flatten=False)"

    # 2) Fully divisible shape (no padding anywhere).
    x2 = jax.random.normal(k2, (2, 1, 4, 16, 32), dtype=jnp.float32)
    out2 = jax.block_until_ready(patch_gather(x2, patch_size=patch_size))
    ref2 = _reference(x2, ones_w, patch_size, True)
    assert jnp.allclose(out2, ref2, atol=1e-5, rtol=1e-5), "mismatch (divisible)"

    # 3) Multi-step grid with a partial final block (G=20, T=8 -> 3 steps).
    x3 = jax.random.normal(k3, (5, 1, 8, 16, 16), dtype=jnp.float32)
    out3 = jax.block_until_ready(
        patch_gather(x3, patch_size=patch_size, block_target_bytes=1 << 14)
    )
    ref3 = _reference(x3, ones_w, patch_size, True)
    assert jnp.allclose(out3, ref3, atol=1e-5, rtol=1e-5), "mismatch (multi-step)"

    # 4) General (non-ones) conv weight path on a ragged shape.
    w = jax.random.normal(k4, (1, 1) + patch_size, dtype=jnp.float32)
    out4 = jax.block_until_ready(patch_gather(x, weight=w, patch_size=patch_size))
    ref4 = _reference(x, w, patch_size, True)
    assert jnp.allclose(out4, ref4, atol=1e-4, rtol=1e-4), "mismatch (weighted)"

    print("KERNEL_OK")
</pallas_src>

<mosaic_0001>
module attributes {stable_mosaic.version = 11 : i64} {
  func.func @_patch_gather_kernel(%arg0: i32, %arg1: memref<4x28x15xf32, #tpu.memory_space<vmem>>, %arg2: memref<15x4xf32, #tpu.memory_space<vmem>>, %arg3: memref<4x16xf32, #tpu.memory_space<vmem>>) attributes {dimension_semantics = [#tpu.dimension_semantics<parallel>], iteration_bounds = array<i64: 1>, scalar_prefetch = 0 : i64, scratch_operands = 0 : i64, tpu.core_type = #tpu.core_type<tc>, window_params = [{transform_indices = @transform_0, window_bounds = array<i64: 4, 28, 15>}, {pipeline_mode = #tpu.pipeline_mode<synchronous>, transform_indices = @transform_1, window_bounds = array<i64: 15, 4>}, {transform_indices = @transform_2, window_bounds = array<i64: 4, 16>}]} {
    %c0 = arith.constant 0 : index
    %c0_0 = arith.constant 0 : index
    %c0_1 = arith.constant 0 : index
    %0 = vector.load %arg1[%c0, %c0_0, %c0_1] : memref<4x28x15xf32, #tpu.memory_space<vmem>>, vector<4x14x15xf32>
    %c0_2 = arith.constant 0 : index
    %c14 = arith.constant 14 : index
    %c0_3 = arith.constant 0 : index
    %1 = vector.load %arg1[%c0_2, %c14, %c0_3] : memref<4x28x15xf32, #tpu.memory_space<vmem>>, vector<4x14x15xf32>
    %2 = arith.addf %0, %1 : vector<4x14x15xf32>
    %c0_4 = arith.constant 0 : index
    %c0_5 = arith.constant 0 : index
    %3 = vector.load %arg2[%c0_4, %c0_5] : memref<15x4xf32, #tpu.memory_space<vmem>>, vector<15x4xf32>
    %4 = vector.extract_strided_slice %2 {offsets = [0, 0, 0], sizes = [4, 1, 15], strides = [1, 1, 1]} : vector<4x14x15xf32> to vector<4x1x15xf32>
    %5 = vector.shape_cast %4 : vector<4x1x15xf32> to vector<4x15xf32>
    %6 = vector.extract_strided_slice %2 {offsets = [0, 1, 0], sizes = [4, 1, 15], strides = [1, 1, 1]} : vector<4x14x15xf32> to vector<4x1x15xf32>
    %7 = vector.shape_cast %6 : vector<4x1x15xf32> to vector<4x15xf32>
    %8 = arith.addf %5, %7 : vector<4x15xf32>
    %9 = vector.extract_strided_slice %2 {offsets = [0, 2, 0], sizes = [4, 1, 15], strides = [1, 1, 1]} : vector<4x14x15xf32> to vector<4x1x15xf32>
    %10 = vector.shape_cast %9 : vector<4x1x15xf32> to vector<4x15xf32>
    %11 = arith.addf %8, %10 : vector<4x15xf32>
    %12 = vector.extract_strided_slice %2 {offsets = [0, 3, 0], sizes = [4, 1, 15], strides = [1, 1, 1]} : vector<4x14x15xf32> to vector<4x1x15xf32>
    %13 = vector.shape_cast %12 : vector<4x1x15xf32> to vector<4x15xf32>
    %14 = arith.addf %11, %13 : vector<4x15xf32>
    %cst = arith.constant dense<0.000000e+00> : vector<4x4xf32>
    %15 = tpu.matmul %14, %3, %cst {dimension_numbers = #tpu.dot_dimension_numbers<[1], [0], [0], [1], [0, 0, 1, 1], [], []>} : vector<4x15xf32>, vector<15x4xf32>, vector<4x4xf32> -> vector<4x4xf32>
    %16 = vector.extract_strided_slice %2 {offsets = [0, 4, 0], sizes = [4, 1, 15], strides = [1, 1, 1]} : vector<4x14x15xf32> to vector<4x1x15xf32>
    %17 = vector.shape_cast %16 : vector<4x1x15xf32> to vector<4x15xf32>
    %18 = vector.extract_strided_slice %2 {offsets = [0, 5, 0], sizes = [4, 1, 15], strides = [1, 1, 1]} : vector<4x14x15xf32> to vector<4x1x15xf32>
    %19 = vector.shape_cast %18 : vector<4x1x15xf32> to vector<4x15xf32>
    %20 = arith.addf %17, %19 : vector<4x15xf32>
    %21 = vector.extract_strided_slice %2 {offsets = [0, 6, 0], sizes = [4, 1, 15], strides = [1, 1, 1]} : vector<4x14x15xf32> to vector<4x1x15xf32>
    %22 = vector.shape_cast %21 : vector<4x1x15xf32> to vector<4x15xf32>
    %23 = arith.addf %20, %22 : vector<4x15xf32>
    %24 = vector.extract_strided_slice %2 {offsets = [0, 7, 0], sizes = [4, 1, 15], strides = [1, 1, 1]} : vector<4x14x15xf32> to vector<4x1x15xf32>
    %25 = vector.shape_cast %24 : vector<4x1x15xf32> to vector<4x15xf32>
    %26 = arith.addf %23, %25 : vector<4x15xf32>
    %cst_6 = arith.constant dense<0.000000e+00> : vector<4x4xf32>
    %27 = tpu.matmul %26, %3, %cst_6 {dimension_numbers = #tpu.dot_dimension_numbers<[1], [0], [0], [1], [0, 0, 1, 1], [], []>} : vector<4x15xf32>, vector<15x4xf32>, vector<4x4xf32> -> vector<4x4xf32>
    %28 = vector.extract_strided_slice %2 {offsets = [0, 8, 0], sizes = [4, 1, 15], strides = [1, 1, 1]} : vector<4x14x15xf32> to vector<4x1x15xf32>
    %29 = vector.shape_cast %28 : vector<4x1x15xf32> to vector<4x15xf32>
    %30 = vector.extract_strided_slice %2 {offsets = [0, 9, 0], sizes = [4, 1, 15], strides = [1, 1, 1]} : vector<4x14x15xf32> to vector<4x1x15xf32>
    %31 = vector.shape_cast %30 : vector<4x1x15xf32> to vector<4x15xf32>
    %32 = arith.addf %29, %31 : vector<4x15xf32>
    %33 = vector.extract_strided_slice %2 {offsets = [0, 10, 0], sizes = [4, 1, 15], strides = [1, 1, 1]} : vector<4x14x15xf32> to vector<4x1x15xf32>
    %34 = vector.shape_cast %33 : vector<4x1x15xf32> to vector<4x15xf32>
    %35 = arith.addf %32, %34 : vector<4x15xf32>
    %36 = vector.extract_strided_slice %2 {offsets = [0, 11, 0], sizes = [4, 1, 15], strides = [1, 1, 1]} : vector<4x14x15xf32> to vector<4x1x15xf32>
    %37 = vector.shape_cast %36 : vector<4x1x15xf32> to vector<4x15xf32>
    %38 = arith.addf %35, %37 : vector<4x15xf32>
    %cst_7 = arith.constant dense<0.000000e+00> : vector<4x4xf32>
    %39 = tpu.matmul %38, %3, %cst_7 {dimension_numbers = #tpu.dot_dimension_numbers<[1], [0], [0], [1], [0, 0, 1, 1], [], []>} : vector<4x15xf32>, vector<15x4xf32>, vector<4x4xf32> -> vector<4x4xf32>
    %40 = vector.extract_strided_slice %2 {offsets = [0, 12, 0], sizes = [4, 1, 15], strides = [1, 1, 1]} : vector<4x14x15xf32> to vector<4x1x15xf32>
    %41 = vector.shape_cast %40 : vector<4x1x15xf32> to vector<4x15xf32>
    %42 = vector.extract_strided_slice %2 {offsets = [0, 13, 0], sizes = [4, 1, 15], strides = [1, 1, 1]} : vector<4x14x15xf32> to vector<4x1x15xf32>
    %43 = vector.shape_cast %42 : vector<4x1x15xf32> to vector<4x15xf32>
    %44 = arith.addf %41, %43 : vector<4x15xf32>
    %cst_8 = arith.constant dense<0.000000e+00> : vector<4x4xf32>
    %45 = tpu.matmul %44, %3, %cst_8 {dimension_numbers = #tpu.dot_dimension_numbers<[1], [0], [0], [1], [0, 0, 1, 1], [], []>} : vector<4x15xf32>, vector<15x4xf32>, vector<4x4xf32> -> vector<4x4xf32>
    %46 = tpu.concatenate %15, %27, %39, %45 in 1 : vector<4x4xf32>, vector<4x4xf32>, vector<4x4xf32>, vector<4x4xf32> -> vector<4x16xf32>
    %c0_9 = arith.constant 0 : index
    %c0_10 = arith.constant 0 : index
    %47 = vector.load %arg3[%c0_9, %c0_10] : memref<4x16xf32, #tpu.memory_space<vmem>>, vector<4x16xf32>
    tpu.vector_store %arg3[%c0_9, %c0_10], %46 {strides = array<i32>} : memref<4x16xf32, #tpu.memory_space<vmem>>, vector<4x16xf32>,
    return
  }
  func.func @transform_0(%arg0: i32) -> (i32, i32, i32) {
    %c0_i32 = arith.constant 0 : i32
    %c0_i32_0 = arith.constant 0 : i32
    %c0_i32_1 = arith.constant 0 : i32
    return %arg0, %c0_i32, %c0_i32_0 : i32, i32, i32
  }
  func.func @transform_1(%arg0: i32) -> (i32, i32) {
    %c0_i32 = arith.constant 0 : i32
    %c0_i32_0 = arith.constant 0 : i32
    %c0_i32_1 = arith.constant 0 : i32
    return %c0_i32, %c0_i32_0 : i32, i32
  }
  func.func @transform_2(%arg0: i32) -> (i32, i32) {
    %c0_i32 = arith.constant 0 : i32
    %c0_i32_0 = arith.constant 0 : i32
    return %arg0, %c0_i32 : i32, i32
  }
}

</mosaic_0001>

<bundles_post_ra>
// kernel: patch_gather.1
= control target key start
LH: loop header
LB: loop body
LE: loop exit
PB: predicated region body
PF: predicated region fallthrough
CT: control target
= control target key end

     0   :  { %vm93_vm0 = vcmask 1046528   ;;  %v546_v0 = vmov 0.0|0.0   ;;  %vm547_vm1 = vmmov 1   ;;  %vm548_vm3 = vmmov 0   ;;  %s551_s15 = smov 12   ;;  %s552_s16 = smov 8   ;;  %s667_s1 = inlined_call_operand.vmem [shape: f32[15,4], index: 1, kind: input, shape index: {}]   ;;  %s668_s0 = inlined_call_operand.vmem [shape: f32[4,28,15], index: 0, kind: input, shape index: {}]   ;;  %s669_s2 = inlined_call_operand.vmem [shape: f32[4,16], index: 2, kind: output, shape index: {}]  }
   0x1   :  { %523 = vmatprep.subr.bf16.mxu0 %v546_v0  ;;  %v35_v1 = vld [vmem:[%s667_s1] sm:$0xff]  ;;  %v36_v2 = vld [vmem:[%s667_s1 + $0x8] sm:$0x7f]  ;;  %vm574_vm2 = vmpackc.low %vm93_vm0, %vm547_vm1  ;;  %527 = vmatprep.subr.bf16.mxu1 %v546_v0  ;;  %v549_v5 = vmov 0.0   ;;  %vm82_vm4 = vcmask 1041409   ;;  %vm85_vm5 = vcmask 1042434  }
   0x2   :  { %v578_v4 = vpack.c.bf16 %v36_v2, %v35_v1  ;;  %499 = vmatprep.mubr.msk.f32.mxu0 %vm548_vm3, %v549_v5  ;;  %506 = vmatprep.mubr.msk.f32.mxu1 %vm548_vm3, %v549_v5  ;;  %v11_v6 = vld [vmem:[%s668_s0] sm:$0xff]  ;;  %v19_v10 = vld [vmem:[%s668_s0 + $0xe] sm:$0xff]  ;;  %v12_v18 = vld [vmem:[%s668_s0 + $0x8] sm:$0x3f]  ;;  %vm88_vm6 = vcmask 1043459   ;;  %vm90_vm7 = vcmask 121856  }
   0x3   :  { %v13_v7 = vld [vmem:[%s668_s0 + $0x20] sm:$0xff]  ;;  %v21_v11 = vld [vmem:[%s668_s0 + $0x2e] sm:$0xff]  ;;  %v27_v14 = vadd.f32 %v19_v10, %v11_v6  ;;  %v14_v19 = vld [vmem:[%s668_s0 + $0x28] sm:$0x3f]  ;;  %vm463_vm8 = vcmask 31744   ;;  %vm465_vm9 = vcmask 64512  }
   0x4   :  { %v15_v8 = vld [vmem:[%s668_s0 + $0x40] sm:$0xff]  ;;  %526 = vmatpush3.bf16.msk.msra.mxu0 %vm574_vm2, %v578_v4  ;;  %530 = vmatpush3.bf16.msk.msra.mxu1 %vm574_vm2, %v578_v4  ;;  %v23_v12 = vld [vmem:[%s668_s0 + $0x4e] sm:$0xff]  ;;  %v29_v15 = vadd.f32 %v21_v11, %v13_v7  ;;  %v16_v24 = vld [vmem:[%s668_s0 + $0x48] sm:$0x3f]  ;;  %vm467_vm10 = vcmask 97280   ;;  %vm469_vm11 = vcmask 125952  }
   0x5   :  { %v17_v9 = vld [vmem:[%s668_s0 + $0x60] sm:$0xff]  ;;  %v25_v13 = vld [vmem:[%s668_s0 + $0x6e] sm:$0xff]  ;;  %531 = vmatprep.subr.bf16.mxu0 %v546_v0  ;;  %v31_v16 = vadd.f32 %v23_v12, %v15_v8  ;;  %535 = vmatprep.subr.bf16.mxu1 %v546_v0  ;;  %v41_v20 = vrot.slane %v27_v14, 1  ;;  %v53_v22 = vrot.slane %v27_v14, 2  ;;  %v18_v25 = vld [vmem:[%s668_s0 + $0x68] sm:$0x3f] }
   0x6   :  { %v33_v17 = vadd.f32 %v25_v13, %v17_v9  ;;  %v42_v21 = vrot.slane %v29_v15, 1  ;;  %v54_v23 = vrot.slane %v29_v15, 2  ;;  %v20_v26 = vld [vmem:[%s668_s0 + $0x16] sm:$0x3f]  ;;  %v65_v34 = vrot.slane %v27_v14, 3 }
   0x7   :  { %v43_v27 = vrot.slane %v31_v16, 1  ;;  %v55_v29 = vrot.slane %v31_v16, 2  ;;  %v22_v31 = vld [vmem:[%s668_s0 + $0x36] sm:$0x3f]  ;;  %v49_v32 = vadd.f32 %v41_v20, %v27_v14  ;;  %v66_v35 = vrot.slane %v29_v15, 3 }
   0x8   :  { %v44_v28 = vrot.slane %v33_v17, 1  ;;  %v56_v30 = vrot.slane %v33_v17, 2  ;;  %v50_v33 = vadd.f32 %v42_v21, %v29_v15  ;;  %v24_v36 = vld [vmem:[%s668_s0 + $0x56] sm:$0x3f]  ;;  %v67_v40 = vrot.slane %v31_v16, 3 }
   0x9   :  { %v26_v37 = vld [vmem:[%s668_s0 + $0x76] sm:$0x3f]  ;;  %v51_v38 = vadd.f32 %v43_v27, %v31_v16  ;;  %v68_v41 = vrot.slane %v33_v17, 3  ;;  %v61_v42 = vadd.f32 %v53_v22, %v49_v32  ;;  %v28_v44 = vadd.f32 %v20_v26, %v12_v18  ;;  %s550_s0 = smov 4  }
   0xa   :  { %v52_v39 = vadd.f32 %v44_v28, %v33_v17  ;;  %v62_v43 = vadd.f32 %v54_v23, %v50_v33  ;;  %v30_v45 = vadd.f32 %v22_v31, %v14_v19  ;;  %v32_v48 = vadd.f32 %v24_v36, %v16_v24 }
   0xb   :  { %v63_v46 = vadd.f32 %v55_v29, %v51_v38  ;;  %v34_v49 = vadd.f32 %v26_v37, %v18_v25  ;;  %v73_v50 = vadd.f32 %v65_v34, %v61_v42  ;;  %v250_v52 = vrot.slane %v28_v44, 1 }
   0xc   :  { %v64_v47 = vadd.f32 %v56_v30, %v52_v39  ;;  %v74_v51 = vadd.f32 %v66_v35, %v62_v43  ;;  %v251_v53 = vrot.slane %v30_v45, 1  ;;  %v252_v56 = vrot.slane %v32_v48, 1 }
   0xd   :  { %v75_v54 = vadd.f32 %v67_v40, %v63_v46  ;;  %v253_v57 = vrot.slane %v34_v49, 1  ;;  %v167_v59 = vrot.slane %v73_v50, 4  ;;  %v258_v61 = vadd.f32 %v250_v52, %v28_v44 }
   0xe   :  { %v76_v55 = vadd.f32 %v68_v41, %v64_v47  ;;  %v81_v58 = vrot.slane %v74_v51, 7  ;;  %v168_v60 = vrot.slane %v74_v51, 3  ;;  %v259_v7 = vadd.f32 %v251_v53, %v30_v45 }
   0xf   :  { %v84_v62 = vrot.slane %v75_v54, 6  ;;  %v170_v0 = vrot.slane %v75_v54, 2  ;;  %v260_v8 = vadd.f32 %v252_v56, %v32_v48  ;;  %v261_v11 = vadd.f32 %v253_v57, %v34_v49 }
  0x10   :  { %v87_v63 = vrot.slane %v76_v55, 5  ;;  %v172_v1 = vrot.slane %v76_v55, 1  ;;  %v83_v2 = vsel %vm82_vm4, %v81_v58, %v73_v50  ;;  %v169_v6 = vsel %vm82_vm4, %v168_v60, %v167_v59 }
  0x11   :  { %v86_v9 = vsel %vm85_vm5, %v84_v62, %v83_v2  ;;  %v171_v10 = vsel %vm85_vm5, %v170_v0, %v169_v6  ;;  %v262_v12 = vrot.slane %v28_v44, 2  ;;  %v263_v15 = vrot.slane %v30_v45, 2 }
  0x12   :  { %v89_v13 = vsel %vm88_vm6, %v87_v63, %v86_v9  ;;  %v173_v14 = vsel %vm88_vm6, %v172_v1, %v171_v10  ;;  %v264_v16 = vrot.slane %v32_v48, 2  ;;  %v265_v17 = vrot.slane %v34_v49, 2 }
  0x13   :  { %500 = vmatmul.mubr.msk.f32.vlgmr.msra.gmra.mrb[0].mxu0 %vm90_vm7, %v89_v13  ;;  %507 = vmatmul.mubr.msk.f32.vlgmr.msra.gmra.mrb[0].mxu1 %vm90_vm7, %v173_v14  ;;  %v270_v18 = vadd.f32 %v262_v12, %v258_v61  ;;  %v274_v19 = vrot.slane %v28_v44, 3  ;;  %v275_v20 = vrot.slane %v30_v45, 3  ;;  %v271_v21 = vadd.f32 %v263_v15, %v259_v7 }
  0x14   :  { %534 = vmatpush3.bf16.msk.msra.mxu0 %vm574_vm2, %v578_v4  ;;  %538 = vmatpush3.bf16.msk.msra.mxu1 %vm574_vm2, %v578_v4  ;;  %v272_v22 = vadd.f32 %v264_v16, %v260_v8  ;;  %v276_v23 = vrot.slane %v32_v48, 3  ;;  %v277_v24 = vrot.slane %v34_v49, 3  ;;  %v273_v25 = vadd.f32 %v265_v17, %v261_v11 }
  0x15   :  { %513 = vmatprep.mubr.msk.f32.mxu0 %vm548_vm3, %v549_v5  ;;  %520 = vmatprep.mubr.msk.f32.mxu1 %vm548_vm3, %v549_v5  ;;  %v282_v26 = vadd.f32 %v274_v19, %v270_v18  ;;  %v372_v27 = vrot.slane %v258_v61, 4  ;;  %v373_v28 = vrot.slane %v259_v7, 3  ;;  %v283_v29 = vadd.f32 %v275_v20, %v271_v21 }
  0x16   :  { %v284_v30 = vadd.f32 %v276_v23, %v272_v22  ;;  %v375_v31 = vrot.slane %v260_v8, 2  ;;  %v377_v32 = vrot.slane %v261_v11, 1  ;;  %v285_v3 = vadd.f32 %v277_v24, %v273_v25 }
  0x17   :  { %v374_v4 = vsel %vm82_vm4, %v373_v28, %v372_v27  ;;  %v290_v33 = vrot.slane %v283_v29, 7 }
  0x18   :  { %v292_v34 = vrot.slane %v284_v30, 6  ;;  %v376_v35 = vsel %vm85_vm5, %v375_v31, %v374_v4  ;;  %v294_v36 = vrot.slane %v285_v3, 5 }
  0x19   :  { %v378_v37 = vsel %vm88_vm6, %v377_v32, %v376_v35  ;;  %v291_v5 = vsel %vm82_vm4, %v290_v33, %v282_v26 }
  0x1a   :  { %521 = vmatmul.mubr.msk.f32.vlgmr.msra.gmra.mrb[2].mxu1 %vm90_vm7, %v378_v37  ;;  %v293_v38 = vsel %vm85_vm5, %v292_v34, %v291_v5 }
  0x1b   :  { %v295_v39 = vsel %vm88_vm6, %v294_v36, %v293_v38 }
  0x1c   :  { %514 = vmatmul.mubr.msk.f32.vlgmr.msra.gmra.mrb[2].mxu0 %vm90_vm7, %v295_v39 }
  0xe6   :  { %v163_v40 = vpop.f32.mrb[0].mxu0  ;;  %v242_v41 = vpop.f32.mrb[0].mxu1 }
  0xe7   :  { %452 = vrot.lane.b32.xlu0 %v242_v41, %s550_s0  ;;  %v501_v42 = vpop.f32.mrb[1].mxu0  ;;  %v508_v43 = vpop.f32.mrb[1].mxu1 }
  0xed   :  { %v447_v44 = vpop.f32.mrb[2].mxu1 }
  0xee   :  { %v522_v45 = vpop.f32.mrb[3].mxu1  ;;  %460 = vrot.lane.b32.xlu1 %v447_v44, %s551_s15 }
  0xef   :  { %v364_v46 = vpop.f32.mrb[2].mxu0 }
  0xf0   :  { %456 = vrot.lane.b32.xlu0 %v364_v46, %s552_s16  ;;  %v515_v47 = vpop.f32.mrb[3].mxu0 }
 0x159   :  { %v453_v48 = vpop.permute.xlu0 %452 }
 0x15a   :  { %v464_v50 = vsel %vm463_vm8, %v163_v40, %v453_v48 }
 0x160   :  { %v461_v49 = vpop.permute.xlu1 %460 }
 0x162   :  { %v457_v51 = vpop.permute.xlu0 %456 }
 0x163   :  { %v466_v52 = vsel %vm465_vm9, %v464_v50, %v457_v51 }
 0x164   :  { %v468_v53 = vsel %vm467_vm10, %v466_v52, %v461_v49 }
 0x165   :  { %470 = vst.msk [vmem:[%s669_s2] sm:$0xf] %vm469_vm11, %v468_v53 }

</bundles_post_ra>
